<compile_context>
chip_gen: v7x
topology: tpu7x:2x2x1
jax: 0.10.0
libtpu: 0.0.40
codegen_flags: <defaults>
</compile_context>

<pallas_src>
import functools

import jax
import jax.numpy as jnp
from jax.experimental import pallas as pl
from jax.experimental.pallas import tpu as pltpu


def _focal_loss_kernel(logits_ref, targets_ref, out_ref, *, alpha, gamma,
                       n_elems, tile_r, chunk_r, steps_per_core, mask_possible):
    core = pl.program_id(0)
    step = pl.program_id(1)

    # Zero this core's resident (1,8,128) accumulator block at its first step.
    @pl.when(step == 0)
    def _():
        out_ref[...] = jnp.zeros_like(out_ref)

    # Logical (unclamped) block index / element offset of this tile.
    # int32 arithmetic: fine for n < 2**31 elements.
    block_idx = core * steps_per_core + step
    tile_base = block_idx * (tile_r * 128)
    n_chunks = tile_r // chunk_r

    def chunk_loss(start):
        # Narrow inputs (bf16 / int8 / bool) are widened here, in-kernel.
        x = logits_ref[pl.ds(start, chunk_r), :].astype(jnp.float32)
        t = targets_ref[pl.ds(start, chunk_r), :].astype(jnp.float32)

        # Numerically-stable BCE with logits (== F.binary_cross_entropy_with_logits).
        e = jnp.exp(-jnp.abs(x))                       # exp(-|x|), reused below
        bce = jnp.maximum(x, 0.0) - x * t + jnp.log1p(e)

        # pt = exp(-bce) == sigmoid((2t-1)*x) for binary targets: reuse e via a
        # stable sigmoid. Approx reciprocal runs on the EUP slot (VALU slack).
        inv_1pe = pl.reciprocal(1.0 + e, approx=True)
        pt = jnp.where((2.0 * t - 1.0) * x >= 0.0, inv_1pe, e * inv_1pe)

        # at = alpha_table[target] with alpha_table = [alpha, 1-alpha]:
        # pure mul-add for binary targets (target 0 -> alpha, 1 -> 1-alpha).
        at = jnp.float32(alpha) + jnp.float32(1.0 - 2.0 * alpha) * t

        # (1 - pt)**gamma: avoid float pow (exp+log) for small integer gamma.
        m = 1.0 - pt
        g = float(gamma)
        if g == 2.0:
            w = m * m
        elif g.is_integer() and 0.0 <= g <= 16.0:
            gi = int(g)
            if gi == 0:
                w = jnp.ones_like(m)
            else:
                w = m
                for _ in range(gi - 1):
                    w = w * m
        else:
            w = jnp.power(jnp.maximum(m, 0.0), jnp.float32(g))

        return at * w * bce

    def fold(vals):
        # (chunk_r,128) -> (8,128): sublane-tile-group adds (pure VPU).
        return vals.reshape(chunk_r // 8, 8, 128).sum(axis=0)

    def accumulate(masked):
        def chunk_body(ci, acc):
            start = ci * chunk_r
            if not isinstance(start, int):
                start = pl.multiple_of(start, chunk_r)
            loss = chunk_loss(start)
            if masked:
                rows = jax.lax.broadcasted_iota(jnp.int32, (chunk_r, 128), 0)
                lanes = jax.lax.broadcasted_iota(jnp.int32, (chunk_r, 128), 1)
                idx = tile_base + (start + rows) * 128 + lanes
                loss = jnp.where(idx < n_elems, loss, 0.0)
            return acc + fold(loss)

        acc0 = jnp.zeros((8, 128), jnp.float32)
        if n_chunks == 1:
            acc = chunk_body(0, acc0)
        else:
            acc = jax.lax.fori_loop(0, n_chunks, chunk_body, acc0)
        out_ref[...] += acc[None, :, :]

    if not mask_possible:
        # Statically known: every block is fully in-bounds -> no mask anywhere.
        accumulate(masked=False)
    else:
        # Only blocks that overrun n (trailing partial tile, lane/row padding,
        # or per-core-rounding duplicates) pay for the iota/compare/select.
        needs_mask = (block_idx + 1) * (tile_r * 128) > n_elems

        @pl.when(jnp.logical_not(needs_mask))
        def _():
            accumulate(masked=False)

        @pl.when(needs_mask)
        def _():
            accumulate(masked=True)


def _device_kind():
    try:
        return jax.devices()[0].device_kind.lower()
    except Exception:
        return ""


def _default_num_cores(kind):
    # Two TensorCores per chip on v7x; one on v5e/v6e (default safe = 1).
    if "v7" in kind or "7x" in kind:
        return 2
    return 1


def _default_tile_rows(kind):
    # v5e scoped-VMEM default is 16 MiB -> keep f32 input double-buffers at 8 MiB.
    if "v5 lite" in kind or "v5e" in kind or "v5lite" in kind:
        return 4096
    # v6e / v7x: 32 MiB scoped default -> 16 MiB of f32 input double-buffers.
    return 8192


def focal_loss(logits, targets, alpha=1.0, gamma=2.0, *, tile_rows=None,
               num_cores=None):
    """Mean binary focal loss (with logits), matching the PyTorch FocalLoss module.

    Inputs are flattened. Targets must be binary {0,1} but may be any dtype
    (float/bf16/int8/bool); both inputs are widened to f32 inside the kernel so
    callers can keep them narrow at the HBM boundary.
    """
    assert logits.shape == targets.shape, (logits.shape, targets.shape)
    n = int(logits.size)
    assert n > 0

    kind = _device_kind()
    if num_cores is None:
        num_cores = _default_num_cores(kind)
    if tile_rows is None:
        tile_rows = _default_tile_rows(kind)

    logits = logits.reshape(-1)
    targets = targets.reshape(-1)

    # Lane-dense layout: rows x 128. Pad only the sub-128 remainder (and truly
    # tiny inputs up to one 32-row tile); 128-aligned inputs reshape for free.
    rows = -(-n // 128)
    rows = max(rows, 32)
    pad = rows * 128 - n
    if pad:
        logits = jnp.pad(logits, (0, pad))
        targets = jnp.pad(targets, (0, pad))
    logits2d = logits.reshape(rows, 128)
    targets2d = targets.reshape(rows, 128)

    # Tile rows: multiple of 32 (int8/bf16 packing), never larger than the
    # array (so only standard trailing partial blocks occur), and a multiple of
    # the 512-row compute chunk when tiles are big.
    tile_r = max(32, (min(int(tile_rows), rows) // 32) * 32)
    if tile_r > 512:
        tile_r = (tile_r // 512) * 512
    chunk_r = min(512, tile_r)

    steps_total = -(-rows // tile_r)
    num_cores = max(1, min(int(num_cores), steps_total))
    steps_per_core = -(-steps_total // num_cores)
    last_block = steps_total - 1

    # Does any grid block overrun the true element count?
    mask_possible = (num_cores * steps_per_core * tile_r * 128) != n

    def in_index_map(c, i):
        # Clamp per-core-rounding overrun blocks onto the last real block; the
        # in-kernel mask zeroes their (logically out-of-range) contribution.
        return (jnp.minimum(c * steps_per_core + i, last_block), 0)

    kernel = functools.partial(
        _focal_loss_kernel,
        alpha=float(alpha), gamma=float(gamma), n_elems=n,
        tile_r=tile_r, chunk_r=chunk_r, steps_per_core=steps_per_core,
        mask_possible=mask_possible,
    )

    in_bytes = (logits2d.size * logits2d.dtype.itemsize
                + targets2d.size * targets2d.dtype.itemsize)
    cost = pl.CostEstimate(
        flops=30 * n,
        transcendentals=3 * n,          # exp, log1p, approx reciprocal
        bytes_accessed=int(in_bytes) + num_cores * 8 * 128 * 4,
    )

    # Grid: (core, row-tile). Leading axis 'parallel' (megacore split on v7x);
    # the row-tile axis is the reduction -> 'arbitrary', out block fixed per core.
    partials = pl.pallas_call(
        kernel,
        out_shape=jax.ShapeDtypeStruct((num_cores, 8, 128), jnp.float32),
        grid_spec=pltpu.PrefetchScalarGridSpec(
            num_scalar_prefetch=0,
            grid=(num_cores, steps_per_core),
            in_specs=[
                pl.BlockSpec((tile_r, 128), in_index_map),
                pl.BlockSpec((tile_r, 128), in_index_map),
            ],
            out_specs=pl.BlockSpec((1, 8, 128), lambda c, i: (c, 0, 0)),
        ),
        compiler_params=pltpu.CompilerParams(
            dimension_semantics=("parallel", "arbitrary"),
        ),
        cost_estimate=cost,
    )(logits2d, targets2d)

    # Tiny finalization (num_cores*8*128 floats) in plain JAX: sum + divide by true N.
    return jnp.sum(partials) / jnp.float32(n)


def _reference_focal_loss(logits, targets, alpha=1.0, gamma=2.0):
    """Pure-JAX reference mirroring the PyTorch module (computed in f32)."""
    x = logits.reshape(-1).astype(jnp.float32)
    t = targets.reshape(-1).astype(jnp.float32)
    bce = jnp.maximum(x, 0.0) - x * t + jnp.log1p(jnp.exp(-jnp.abs(x)))
    alpha_tbl = jnp.array([alpha, 1.0 - alpha], dtype=jnp.float32)
    at = alpha_tbl[t.astype(jnp.int32)]
    pt = jnp.exp(-bce)
    loss = at * (1.0 - pt) ** gamma * bce
    return jnp.mean(loss)


if __name__ == "__main__":
    key = jax.random.PRNGKey(0)
    k1, k2, k3, k4, k5, k6 = jax.random.split(key, 6)

    # Tolerance: 1e-3 because pt uses approx reciprocal (~2^-12 rel. error).
    TOL = 1e-3

    # Case 1: module defaults (alpha=1, gamma=2); small binary-segmentation
    # shaped batch (2, 1, 16, 16) -> 512 elements.
    logits_a = jax.random.normal(k1, (2, 1, 16, 16), dtype=jnp.float32)
    targets_a = jax.random.bernoulli(k2, p=0.5, shape=(2, 1, 16, 16)).astype(jnp.float32)
    out_a = jax.block_until_ready(focal_loss(logits_a, targets_a, alpha=1.0, gamma=2.0))
    ref_a = _reference_focal_loss(logits_a, targets_a, alpha=1.0, gamma=2.0)
    assert jnp.allclose(out_a, ref_a, atol=TOL, rtol=TOL), (out_a, ref_a)

    # Case 2: non-default alpha, integer gamma=3, ragged N=1000 (exercises the
    # lane-remainder pad and the gated tail mask).
    logits_b = jax.random.normal(k3, (1000,), dtype=jnp.float32)
    targets_b = jax.random.bernoulli(k4, p=0.3, shape=(1000,)).astype(jnp.float32)
    out_b = jax.block_until_ready(focal_loss(logits_b, targets_b, alpha=0.25, gamma=3.0))
    ref_b = _reference_focal_loss(logits_b, targets_b, alpha=0.25, gamma=3.0)
    assert jnp.allclose(out_b, ref_b, atol=TOL, rtol=TOL), (out_b, ref_b)

    # Case 3: narrow-dtype contract — bf16 logits + int8 {0,1} targets widen
    # in-kernel (no wrapper casts); (4, 3, 32, 32) -> 12288 elements.
    logits_c = jax.random.normal(k5, (4, 3, 32, 32), dtype=jnp.float32).astype(jnp.bfloat16)
    targets_c = jax.random.bernoulli(k6, p=0.4, shape=(4, 3, 32, 32)).astype(jnp.int8)
    out_c = jax.block_until_ready(focal_loss(logits_c, targets_c, alpha=0.25, gamma=2.0))
    ref_c = _reference_focal_loss(logits_c, targets_c, alpha=0.25, gamma=2.0)
    assert jnp.allclose(out_c, ref_c, atol=TOL, rtol=TOL), (out_c, ref_c)

    print("KERNEL_OK")
</pallas_src>

<mosaic_0001>
module attributes {stable_mosaic.version = 11 : i64} {
  func.func @_focal_loss_kernel(%arg0: i32, %arg1: i32, %arg2: memref<32x128xf32, #tpu.memory_space<vmem>>, %arg3: memref<32x128xf32, #tpu.memory_space<vmem>>, %arg4: memref<1x8x128xf32, #tpu.memory_space<vmem>>) attributes {dimension_semantics = [#tpu.dimension_semantics<parallel>, #tpu.dimension_semantics<arbitrary>], iteration_bounds = array<i64: 1, 1>, scalar_prefetch = 0 : i64, scratch_operands = 0 : i64, tpu.core_type = #tpu.core_type<tc>, window_params = [{transform_indices = @transform_0, window_bounds = array<i64: 32, 128>}, {transform_indices = @transform_1, window_bounds = array<i64: 32, 128>}, {transform_indices = @transform_2, window_bounds = array<i64: 1, 8, 128>}]} {
    %c0_i32 = arith.constant 0 : i32
    %0 = arith.cmpi eq, %arg1, %c0_i32 : i32
    %1 = arith.extui %0 : i1 to i32
    %c0_i32_0 = arith.constant 0 : i32
    %2 = arith.cmpi ne, %1, %c0_i32_0 : i32
    scf.if %2 {
      %cst = arith.constant 0.000000e+00 : f32
      %14 = vector.broadcast %cst : f32 to vector<1x8x128xf32>
      %c0 = arith.constant 0 : index
      %c0_5 = arith.constant 0 : index
      %c0_6 = arith.constant 0 : index
      %15 = vector.load %arg4[%c0, %c0_5, %c0_6] : memref<1x8x128xf32, #tpu.memory_space<vmem>>, vector<1x8x128xf32>
      tpu.vector_store %arg4[%c0, %c0_5, %c0_6], %14 {strides = array<i32>} : memref<1x8x128xf32, #tpu.memory_space<vmem>>, vector<1x8x128xf32>,
    } else {
    }
    %c1_i32 = arith.constant 1 : i32
    %3 = arith.muli %arg0, %c1_i32 : i32
    %4 = arith.addi %3, %arg1 : i32
    %c4096_i32 = arith.constant 4096 : i32
    %5 = arith.muli %4, %c4096_i32 : i32
    %c1_i32_1 = arith.constant 1 : i32
    %6 = arith.addi %4, %c1_i32_1 : i32
    %c4096_i32_2 = arith.constant 4096 : i32
    %7 = arith.muli %6, %c4096_i32_2 : i32
    %c512_i32 = arith.constant 512 : i32
    %8 = arith.cmpi sgt, %7, %c512_i32 : i32
    %true = arith.constant true
    %9 = arith.xori %8, %true : i1
    %10 = arith.extui %9 : i1 to i32
    %c0_i32_3 = arith.constant 0 : i32
    %11 = arith.cmpi ne, %10, %c0_i32_3 : i32
    scf.if %11 {
      %cst = arith.constant 0.000000e+00 : f32
      %14 = vector.broadcast %cst : f32 to vector<8x128xf32>
      %c0 = arith.constant 0 : index
      %c0_5 = arith.constant 0 : index
      %15 = vector.load %arg2[%c0, %c0_5] : memref<32x128xf32, #tpu.memory_space<vmem>>, vector<32x128xf32>
      %c0_6 = arith.constant 0 : index
      %c0_7 = arith.constant 0 : index
      %16 = vector.load %arg3[%c0_6, %c0_7] : memref<32x128xf32, #tpu.memory_space<vmem>>, vector<32x128xf32>
      %17 = math.absf %15 : vector<32x128xf32>
      %cst_8 = arith.constant 0.000000e+00 : f32
      %18 = vector.broadcast %cst_8 : f32 to vector<32x128xf32>
      %19 = arith.subf %18, %17 : vector<32x128xf32>
      %20 = math.exp %19 : vector<32x128xf32>
      %cst_9 = arith.constant 0.000000e+00 : f32
      %21 = vector.broadcast %cst_9 : f32 to vector<32x128xf32>
      %22 = arith.maximumf %15, %21 : vector<32x128xf32>
      %23 = arith.mulf %15, %16 : vector<32x128xf32>
      %24 = arith.subf %22, %23 : vector<32x128xf32>
      %25 = math.log1p %20 : vector<32x128xf32>
      %26 = arith.addf %24, %25 : vector<32x128xf32>
      %cst_10 = arith.constant 1.000000e+00 : f32
      %27 = vector.broadcast %cst_10 : f32 to vector<32x128xf32>
      %28 = arith.addf %27, %20 : vector<32x128xf32>
      %29 = tpu.reciprocal %28 {approx = true} : vector<32x128xf32> -> vector<32x128xf32>
      %cst_11 = arith.constant 2.000000e+00 : f32
      %30 = vector.broadcast %cst_11 : f32 to vector<32x128xf32>
      %31 = arith.mulf %30, %16 : vector<32x128xf32>
      %cst_12 = arith.constant 1.000000e+00 : f32
      %32 = vector.broadcast %cst_12 : f32 to vector<32x128xf32>
      %33 = arith.subf %31, %32 : vector<32x128xf32>
      %34 = arith.mulf %33, %15 : vector<32x128xf32>
      %cst_13 = arith.constant 0.000000e+00 : f32
      %35 = vector.broadcast %cst_13 : f32 to vector<32x128xf32>
      %36 = arith.cmpf oge, %34, %35 : vector<32x128xf32>
      %37 = arith.mulf %20, %29 : vector<32x128xf32>
      %38 = arith.select %36, %29, %37 : vector<32x128xi1>, vector<32x128xf32>
      %cst_14 = arith.constant -1.000000e+00 : f32
      %39 = vector.broadcast %cst_14 : f32 to vector<32x128xf32>
      %40 = arith.mulf %39, %16 : vector<32x128xf32>
      %cst_15 = arith.constant 1.000000e+00 : f32
      %41 = vector.broadcast %cst_15 : f32 to vector<32x128xf32>
      %42 = arith.addf %41, %40 : vector<32x128xf32>
      %cst_16 = arith.constant 1.000000e+00 : f32
      %43 = vector.broadcast %cst_16 : f32 to vector<32x128xf32>
      %44 = arith.subf %43, %38 : vector<32x128xf32>
      %45 = arith.mulf %44, %44 : vector<32x128xf32>
      %46 = arith.mulf %42, %45 : vector<32x128xf32>
      %47 = arith.mulf %46, %26 : vector<32x128xf32>
      %48 = vector.shape_cast %47 : vector<32x128xf32> to vector<4x8x128xf32>
      %cst_17 = arith.constant dense<0.000000e+00> : vector<8x128xf32>
      %49 = vector.multi_reduction <add>, %48, %cst_17 [0] : vector<4x8x128xf32> to vector<8x128xf32>
      %50 = arith.addf %14, %49 : vector<8x128xf32>
      %c0_18 = arith.constant 0 : index
      %c0_19 = arith.constant 0 : index
      %c0_20 = arith.constant 0 : index
      %51 = vector.load %arg4[%c0_18, %c0_19, %c0_20] : memref<1x8x128xf32, #tpu.memory_space<vmem>>, vector<1x8x128xf32>
      %52 = vector.shape_cast %50 : vector<8x128xf32> to vector<1x8x128xf32>
      %53 = arith.addf %51, %52 : vector<1x8x128xf32>
      %c0_21 = arith.constant 0 : index
      %c0_22 = arith.constant 0 : index
      %c0_23 = arith.constant 0 : index
      %54 = vector.load %arg4[%c0_21, %c0_22, %c0_23] : memref<1x8x128xf32, #tpu.memory_space<vmem>>, vector<1x8x128xf32>
      tpu.vector_store %arg4[%c0_21, %c0_22, %c0_23], %53 {strides = array<i32>} : memref<1x8x128xf32, #tpu.memory_space<vmem>>, vector<1x8x128xf32>,
    } else {
    }
    %12 = arith.extui %8 : i1 to i32
    %c0_i32_4 = arith.constant 0 : i32
    %13 = arith.cmpi ne, %12, %c0_i32_4 : i32
    scf.if %13 {
      %cst = arith.constant 0.000000e+00 : f32
      %14 = vector.broadcast %cst : f32 to vector<8x128xf32>
      %c0 = arith.constant 0 : index
      %c0_5 = arith.constant 0 : index
      %15 = vector.load %arg2[%c0, %c0_5] : memref<32x128xf32, #tpu.memory_space<vmem>>, vector<32x128xf32>
      %c0_6 = arith.constant 0 : index
      %c0_7 = arith.constant 0 : index
      %16 = vector.load %arg3[%c0_6, %c0_7] : memref<32x128xf32, #tpu.memory_space<vmem>>, vector<32x128xf32>
      %17 = math.absf %15 : vector<32x128xf32>
      %cst_8 = arith.constant 0.000000e+00 : f32
      %18 = vector.broadcast %cst_8 : f32 to vector<32x128xf32>
      %19 = arith.subf %18, %17 : vector<32x128xf32>
      %20 = math.exp %19 : vector<32x128xf32>
      %cst_9 = arith.constant 0.000000e+00 : f32
      %21 = vector.broadcast %cst_9 : f32 to vector<32x128xf32>
      %22 = arith.maximumf %15, %21 : vector<32x128xf32>
      %23 = arith.mulf %15, %16 : vector<32x128xf32>
      %24 = arith.subf %22, %23 : vector<32x128xf32>
      %25 = math.log1p %20 : vector<32x128xf32>
      %26 = arith.addf %24, %25 : vector<32x128xf32>
      %cst_10 = arith.constant 1.000000e+00 : f32
      %27 = vector.broadcast %cst_10 : f32 to vector<32x128xf32>
      %28 = arith.addf %27, %20 : vector<32x128xf32>
      %29 = tpu.reciprocal %28 {approx = true} : vector<32x128xf32> -> vector<32x128xf32>
      %cst_11 = arith.constant 2.000000e+00 : f32
      %30 = vector.broadcast %cst_11 : f32 to vector<32x128xf32>
      %31 = arith.mulf %30, %16 : vector<32x128xf32>
      %cst_12 = arith.constant 1.000000e+00 : f32
      %32 = vector.broadcast %cst_12 : f32 to vector<32x128xf32>
      %33 = arith.subf %31, %32 : vector<32x128xf32>
      %34 = arith.mulf %33, %15 : vector<32x128xf32>
      %cst_13 = arith.constant 0.000000e+00 : f32
      %35 = vector.broadcast %cst_13 : f32 to vector<32x128xf32>
      %36 = arith.cmpf oge, %34, %35 : vector<32x128xf32>
      %37 = arith.mulf %20, %29 : vector<32x128xf32>
      %38 = arith.select %36, %29, %37 : vector<32x128xi1>, vector<32x128xf32>
      %cst_14 = arith.constant -1.000000e+00 : f32
      %39 = vector.broadcast %cst_14 : f32 to vector<32x128xf32>
      %40 = arith.mulf %39, %16 : vector<32x128xf32>
      %cst_15 = arith.constant 1.000000e+00 : f32
      %41 = vector.broadcast %cst_15 : f32 to vector<32x128xf32>
      %42 = arith.addf %41, %40 : vector<32x128xf32>
      %cst_16 = arith.constant 1.000000e+00 : f32
      %43 = vector.broadcast %cst_16 : f32 to vector<32x128xf32>
      %44 = arith.subf %43, %38 : vector<32x128xf32>
      %45 = arith.mulf %44, %44 : vector<32x128xf32>
      %46 = arith.mulf %42, %45 : vector<32x128xf32>
      %47 = arith.mulf %46, %26 : vector<32x128xf32>
      %48 = tpu.iota {dimensions = array<i32: 0>} : vector<32x128xi32>
      %49 = tpu.iota {dimensions = array<i32: 1>} : vector<32x128xi32>
      %c0_i32_17 = arith.constant 0 : i32
      %50 = vector.broadcast %c0_i32_17 : i32 to vector<32x128xi32>
      %51 = arith.addi %50, %48 : vector<32x128xi32>
      %c128_i32 = arith.constant 128 : i32
      %52 = vector.broadcast %c128_i32 : i32 to vector<32x128xi32>
      %53 = arith.muli %51, %52 : vector<32x128xi32>
      %54 = vector.broadcast %5 : i32 to vector<32x128xi32>
      %55 = arith.addi %54, %53 : vector<32x128xi32>
      %56 = arith.addi %55, %49 : vector<32x128xi32>
      %c512_i32_18 = arith.constant 512 : i32
      %57 = vector.broadcast %c512_i32_18 : i32 to vector<32x128xi32>
      %58 = arith.cmpi slt, %56, %57 : vector<32x128xi32>
      %cst_19 = arith.constant 0.000000e+00 : f32
      %59 = vector.broadcast %cst_19 : f32 to vector<32x128xf32>
      %60 = arith.select %58, %47, %59 : vector<32x128xi1>, vector<32x128xf32>
      %61 = vector.shape_cast %60 : vector<32x128xf32> to vector<4x8x128xf32>
      %cst_20 = arith.constant dense<0.000000e+00> : vector<8x128xf32>
      %62 = vector.multi_reduction <add>, %61, %cst_20 [0] : vector<4x8x128xf32> to vector<8x128xf32>
      %63 = arith.addf %14, %62 : vector<8x128xf32>
      %c0_21 = arith.constant 0 : index
      %c0_22 = arith.constant 0 : index
      %c0_23 = arith.constant 0 : index
      %64 = vector.load %arg4[%c0_21, %c0_22, %c0_23] : memref<1x8x128xf32, #tpu.memory_space<vmem>>, vector<1x8x128xf32>
      %65 = vector.shape_cast %63 : vector<8x128xf32> to vector<1x8x128xf32>
      %66 = arith.addf %64, %65 : vector<1x8x128xf32>
      %c0_24 = arith.constant 0 : index
      %c0_25 = arith.constant 0 : index
      %c0_26 = arith.constant 0 : index
      %67 = vector.load %arg4[%c0_24, %c0_25, %c0_26] : memref<1x8x128xf32, #tpu.memory_space<vmem>>, vector<1x8x128xf32>
      tpu.vector_store %arg4[%c0_24, %c0_25, %c0_26], %66 {strides = array<i32>} : memref<1x8x128xf32, #tpu.memory_space<vmem>>, vector<1x8x128xf32>,
    } else {
    }
    return
  }
  func.func @transform_0(%arg0: i32, %arg1: i32) -> (i32, i32) {
    %c1_i32 = arith.constant 1 : i32
    %0 = arith.muli %arg0, %c1_i32 : i32
    %1 = arith.addi %0, %arg1 : i32
    %c0_i32 = arith.constant 0 : i32
    %2 = arith.minsi %1, %c0_i32 : i32
    %c0_i32_0 = arith.constant 0 : i32
    %c0_i32_1 = arith.constant 0 : i32
    return %2, %c0_i32_0 : i32, i32
  }
  func.func @transform_1(%arg0: i32, %arg1: i32) -> (i32, i32) {
    %c1_i32 = arith.constant 1 : i32
    %0 = arith.muli %arg0, %c1_i32 : i32
    %1 = arith.addi %0, %arg1 : i32
    %c0_i32 = arith.constant 0 : i32
    %2 = arith.minsi %1, %c0_i32 : i32
    %c0_i32_0 = arith.constant 0 : i32
    %c0_i32_1 = arith.constant 0 : i32
    return %2, %c0_i32_0 : i32, i32
  }
  func.func @transform_2(%arg0: i32, %arg1: i32) -> (i32, i32, i32) {
    %c0_i32 = arith.constant 0 : i32
    %c0_i32_0 = arith.constant 0 : i32
    %c0_i32_1 = arith.constant 0 : i32
    return %arg0, %c0_i32, %c0_i32_0 : i32, i32, i32
  }
}

</mosaic_0001>

<bundles_post_ra>
// kernel: tpu_custom_call.1
= control target key start
LH: loop header
LB: loop body
LE: loop exit
PB: predicated region body
PF: predicated region fallthrough
CT: control target
= control target key end

     0   :  { %7 = vsyncpa [#allocation3], 0  ;;  %s680_s0 = inlined_call_operand.hbm [shape: f32[32,128], index: 0, kind: input, shape index: {}]   ;;  %s681_s1 = inlined_call_operand.hbm [shape: f32[32,128], index: 1, kind: input, shape index: {}]   ;;  %s682_s2 = inlined_call_operand.hbm [shape: f32[1,8,128], index: 2, kind: output, shape index: {}]  }
   0x1   :  { %8 = vsyncpa [#allocation6], 0 }
   0x2   :  { %9 = vsyncpa [#allocation4], 0  ;;  %s513_s9 = smov [#allocation2]   ;;  %s441_s13 = scalar_lea.hbm %s680_s0, 512 }
   0x3   :  { %s21_s10 = sshll.u32 %s513_s9, 4  ;;  %p442_p0 = scmp.ne.s32.totalorder %s680_s0, %s441_s13  ;;  %s22_s10 = int_to_ptr.vmem [resolvable:$true] %s21_s10 }
   0x4   :  { %p445_p1 = scmp.lt.u32.totalorder %s441_s13, %s680_s0 }
   0x6   :  { %p447_p2 = pnand %p445_p1, %p442_p0 }
   0x8   :  { %450 = shalt.err (!%p447_p2)
}
   0x9   :  { %s451_s18 = scalar_lea.vmem %s22_s10, 512  ;;  %p456_p4 = scmp.lt.s32.totalorder %s22_s10, %s22_s10 }
   0xa   :  { %p452_p3 = scmp.ne.s32.totalorder %s22_s10, %s451_s18  ;;  %p457_p5 = scmp.lt.s32.totalorder %s451_s18, %s451_s18 }
   0xc   :  { %p458_p6 = por %p457_p5, %p456_p4 }
   0xe   :  { %p459_p7 = pnand %p458_p6, %p452_p3 }
  0x10   :  { %462 = shalt.err (!%p459_p7)
}
  0x11   :  { %s514_s19 = smov 128   ;;  %s515_s20 = smov 8  }
  0x12   :  { %27 = dma.hbm_to_vmem [thread:$0]  %s680_s0, 512, %s22_s10, [#allocation3], %s514_s19, %s514_s19, %s515_s20  }
  0x13   :  { %s516_s23 = smov [#allocation5]   ;;  %s463_s27 = scalar_lea.hbm %s681_s1, 512 }
  0x14   :  { %s39_s24 = sshll.u32 %s516_s23, 4  ;;  %p464_p8 = scmp.ne.s32.totalorder %s681_s1, %s463_s27  ;;  %s40_s24 = int_to_ptr.vmem [resolvable:$true] %s39_s24 }
  0x15   :  { %p467_p9 = scmp.lt.u32.totalorder %s463_s27, %s681_s1 }
  0x17   :  { %p469_p10 = pnand %p467_p9, %p464_p8 }
  0x19   :  { %472 = shalt.err (!%p469_p10)
}
  0x1a   :  { %s473_s4 = scalar_lea.vmem %s40_s24, 512  ;;  %p478_p12 = scmp.lt.s32.totalorder %s40_s24, %s40_s24 }
  0x1b   :  { %p474_p11 = scmp.ne.s32.totalorder %s40_s24, %s473_s4  ;;  %p479_p13 = scmp.lt.s32.totalorder %s473_s4, %s473_s4 }
  0x1d   :  { %p480_p0 = por %p479_p13, %p478_p12 }
  0x1f   :  { %p481_p1 = pnand %p480_p0, %p474_p11 }
  0x21   :  { %484 = shalt.err (!%p481_p1)
}
  0x22   :  { %45 = dma.hbm_to_vmem [thread:$0]  %s681_s1, 512, %s40_s24, [#allocation6], %s514_s19, %s514_s19, %s515_s20  }
  0x23   :  { %507 = dma.done.wait [#allocation3], 512  }
  0x24   :  { %508 = vsyncadd [#allocation3], 4294966784 }
  0x25   :  { %509 = dma.done.wait [#allocation6], 512  }
  0x26   :  { %510 = vsyncadd [#allocation6], 4294966784  ;;  %v557_v0 = vld [vmem:[#allocation2] sm:$0xff]  ;;  %v559_v1 = vld [vmem:[#allocation2 + $0x8] sm:$0xff]  ;;  %v348_v15 = vlaneseq  ;;  %s517_s1 = smov [#allocation7]  }
  0x27   :  { %v561_v2 = vld [vmem:[#allocation2 + $0x10] sm:$0xff]  ;;  %v563_v3 = vld [vmem:[#allocation2 + $0x18] sm:$0xff]  ;;  %v224_v4 = vand.u32 2147483647, %v557_v0  ;;  %v225_v5 = vand.u32 2147483647, %v559_v1 }
  0x28   :  { %v226_v6 = vand.u32 2147483647, %v561_v2  ;;  %v227_v7 = vand.u32 2147483647, %v563_v3  ;;  %v349_v17 = vshrl.u32 %v348_v15, 7  ;;  %v571_v21 = vand.u32 127, %v348_v15 }
  0x29   :  { %v228_v8 = vsub.f32 0.0, %v224_v4  ;;  %v229_v9 = vsub.f32 0.0, %v225_v5  ;;  %v220_v25 = vld [vmem:[#allocation5] sm:$0xff]  ;;  %v221_v29 = vld [vmem:[#allocation5 + $0x8] sm:$0xff]  ;;  %v240_v30 = vmax.f32 %v557_v0, 0.0  ;;  %v222_v35 = vld [vmem:[#allocation5 + $0x10] sm:$0xff] }
  0x2a   :  { %v230_v10 = vsub.f32 0.0, %v226_v6  ;;  %v231_v11 = vsub.f32 0.0, %v227_v7  ;;  %v350_v18 = vadd.s32 8, %v349_v17  ;;  %v351_v19 = vadd.s32 16, %v349_v17  ;;  %v223_v39 = vld [vmem:[#allocation5 + $0x18] sm:$0xff]  ;;  %s389_s6 = sshll.u32 %s517_s1, 4  ;;  %s390_s6 = int_to_ptr.vmem [resolvable:$true] %s389_s6 }
  0x2b   :  { %v232_v12 = vmul.f32 1.442695, %v228_v8  ;;  %v234_v13 = vmul.f32 1.442695, %v229_v9  ;;  %v569_v20 = vadd.s32 24, %v349_v17  ;;  %v355_v22 = vmul.u32 128, %v349_v17  ;;  %p490_p3 = scmp.lt.s32.totalorder %s390_s6, %s390_s6 }
  0x2c   :  { %v236_v14 = vmul.f32 1.442695, %v230_v10  ;;  %v238_v16 = vmul.f32 1.442695, %v231_v11  ;;  %v356_v27 = vmul.u32 128, %v350_v18  ;;  %v357_v31 = vmul.u32 128, %v351_v19 }
  0x2d   :  { %417 = vpow2.f32 %v232_v12  ;;  %v358_v32 = vmul.u32 128, %v569_v20  ;;  %v583_v33 = vadd.s32 %v355_v22, %v571_v21  ;;  %v244_v36 = vmul.f32 %v220_v25, %v557_v0  ;;  %s485_s7 = scalar_lea.vmem %s390_s6, 128 }
  0x2e   :  { %419 = vpow2.f32 %v234_v13  ;;  %v245_v37 = vmul.f32 %v221_v29, %v559_v1  ;;  %v241_v40 = vmax.f32 %v559_v1, 0.0  ;;  %v242_v41 = vmax.f32 %v561_v2, 0.0  ;;  %p486_p2 = scmp.ne.s32.totalorder %s390_s6, %s485_s7  ;;  %p491_p4 = scmp.lt.s32.totalorder %s485_s7, %s485_s7 }
  0x2f   :  { %421 = vpow2.f32 %v236_v14  ;;  %v300_v43 = vmul.f32 2.0, %v220_v25  ;;  %v246_v44 = vmul.f32 %v222_v35, %v561_v2  ;;  %v301_v46 = vmul.f32 2.0, %v221_v29 }
  0x30   :  { %423 = vpow2.f32 %v238_v16  ;;  %v302_v47 = vmul.f32 2.0, %v222_v35  ;;  %v596_v48 = vadd.s32 %v356_v27, %v571_v21  ;;  %v599_v49 = vadd.s32 %v357_v31, %v571_v21  ;;  %p492_p5 = por %p491_p4, %p490_p3 }
  0x31   :  { %v243_v50 = vmax.f32 %v563_v3, 0.0  ;;  %v247_v51 = vmul.f32 %v223_v39, %v563_v3  ;;  %v303_v52 = vmul.f32 2.0, %v223_v39  ;;  %v603_v53 = vsub.f32 %v240_v30, %v244_v36 }
  0x32   :  { %v407_v55 = vadd.f32 -1.0, %v300_v43  ;;  %v606_v56 = vsub.f32 %v241_v40, %v245_v37  ;;  %v608_v57 = vsub.f32 %v242_v41, %v246_v44  ;;  %v408_v58 = vadd.f32 -1.0, %v301_v46  ;;  %p493_p6 = pnand %p492_p5, %p486_p2 }
  0x33   :  { %v409_v60 = vadd.f32 -1.0, %v302_v47  ;;  %v324_v61 = vmul.f32 -1.0, %v220_v25  ;;  %v410_v63 = vadd.f32 -1.0, %v303_v52  ;;  %v325_v4 = vmul.f32 -1.0, %v221_v29 }
  0x34   :  { %v612_v5 = vsub.f32 %v243_v50, %v247_v51  ;;  %v308_v8 = vmul.f32 %v407_v55, %v557_v0  ;;  %v309_v11 = vmul.f32 %v408_v58, %v559_v1  ;;  %v326_v12 = vmul.f32 -1.0, %v222_v35 }
  0x35   :  { %v327_v13 = vmul.f32 -1.0, %v223_v39  ;;  %v310_v16 = vmul.f32 %v409_v60, %v561_v2  ;;  %v328_v17 = vadd.f32 1.0, %v324_v61  ;;  %v311_v25 = vmul.f32 %v410_v63, %v563_v3 }
  0x36   :  { %v329_v0 = vadd.f32 1.0, %v325_v4  ;;  %vm312_vm0 = vcmp.ge.f32.partialorder %v308_v8, 0.0  ;;  %vm313_vm2 = vcmp.ge.f32.partialorder %v309_v11, 0.0  ;;  %v330_v35 = vadd.f32 1.0, %v326_v12 }
  0x37   :  { %v573_v23 = vpop.eup %417  ;;  %vm314_vm4 = vcmp.ge.f32.partialorder %v310_v16, 0.0  ;;  %vm315_vm7 = vcmp.ge.f32.partialorder %v311_v25, 0.0  ;;  %vm368_vm8 = vcmp.lt.s32.totalorder %v583_v33, 512  ;;  %vm369_vm9 = vcmp.lt.s32.totalorder %v596_v48, 512 }
  0x38   :  { %v575_v24 = vpop.eup %419  ;;  %v252_v26 = vadd.f32 1.0, %v573_v23  ;;  %v255_v54 = vmul.f32 -0.5, %v573_v23  ;;  %v258_v10 = vand.u32 2147483647, %v573_v23  ;;  %vm370_vm10 = vcmp.lt.s32.totalorder %v599_v49, 512 }
  0x39   :  { %v578_v28 = vpop.eup %421  ;;  %v261_v38 = vadd.f32 1.0, %v575_v24  ;;  %v264_v59 = vmul.f32 -0.5, %v575_v24  ;;  %v267_v15 = vand.u32 2147483647, %v575_v24 }
  0x3a   :  { %v585_v34 = vpop.eup %423  ;;  %425 = vlog2.f32 %v252_v26  ;;  %v270_v42 = vadd.f32 1.0, %v578_v28  ;;  %v273_v62 = vmul.f32 -0.5, %v578_v28  ;;  %v256_v6 = vadd.f32 1.0, %v255_v54 }
  0x3b   :  { %427 = vlog2.f32 %v261_v38  ;;  %v279_v45 = vadd.f32 1.0, %v585_v34  ;;  %v282_v7 = vmul.f32 -0.5, %v585_v34  ;;  %v265_v14 = vadd.f32 1.0, %v264_v59 }
  0x3c   :  { %429 = vlog2.f32 %v270_v42  ;;  %v274_v19 = vadd.f32 1.0, %v273_v62  ;;  %v276_v22 = vand.u32 2147483647, %v578_v28  ;;  %v257_v29 = vmul.f32 %v573_v23, %v256_v6 }
  0x3d   :  { %431 = vlog2.f32 %v279_v45  ;;  %v283_v1 = vadd.f32 1.0, %v282_v7  ;;  %vm623_vm1 = vcmp.lt.f32.partialorder %v258_v10, 0.0004427343  ;;  %v285_v2 = vand.u32 2147483647, %v585_v34 }
  0x3e   :  { %433 = vrcp.f32 %v252_v26  ;;  %v266_v3 = vmul.f32 %v575_v24, %v265_v14  ;;  %vm629_vm3 = vcmp.lt.f32.partialorder %v267_v15, 0.0004427343  ;;  %v275_v41 = vmul.f32 %v578_v28, %v274_v19 }
  0x3f   :  { %435 = vrcp.f32 %v261_v38  ;;  %vm634_vm5 = vcmp.lt.f32.partialorder %v276_v22, 0.0004427343  ;;  %v284_v47 = vmul.f32 %v585_v34, %v283_v1  ;;  %vm643_vm6 = vcmp.lt.f32.partialorder %v285_v2, 0.0004427343 }
  0x40   :  { %437 = vrcp.f32 %v270_v42 }
  0x41   :  { %439 = vrcp.f32 %v279_v45 }
  0x44   :  { %v426_v9 = vpop.eup %425 }
  0x45   :  { %v428_v18 = vpop.eup %427  ;;  %v254_v27 = vmul.f32 0.6931472, %v426_v9 }
  0x46   :  { %v430_v26 = vpop.eup %429  ;;  %v263_v37 = vmul.f32 0.6931472, %v428_v18 }
  0x47   :  { %v432_v30 = vpop.eup %431  ;;  %v272_v40 = vmul.f32 0.6931472, %v430_v26  ;;  %v260_v45 = vsel %vm623_vm1, %v257_v29, %v254_v27 }
  0x48   :  { %v434_v36 = vpop.eup %433  ;;  %v281_v46 = vmul.f32 0.6931472, %v432_v30  ;;  %v288_v61 = vadd.f32 %v260_v45, %v603_v53  ;;  %v367_v53 = vadd.s32 %v358_v32, %v571_v21 }
  0x49   :  { %v436_v39 = vpop.eup %435  ;;  %v316_v43 = vmul.f32 %v434_v36, %v573_v23  ;;  %v269_v23 = vsel %vm629_vm3, %v266_v3, %v263_v37 }
  0x4a   :  { %v438_v44 = vpop.eup %437  ;;  %v317_v50 = vmul.f32 %v436_v39, %v575_v24  ;;  %v278_v24 = vsel %vm634_vm5, %v275_v41, %v272_v40  ;;  %v289_v8 = vadd.f32 %v269_v23, %v606_v56  ;;  %vm371_vm11 = vcmp.lt.s32.totalorder %v367_v53, 512 }
  0x4b   :  { %v440_v51 = vpop.eup %439  ;;  %v318_v54 = vmul.f32 %v438_v44, %v578_v28  ;;  %v320_v55 = vsel %vm312_vm0, %v434_v36, %v316_v43  ;;  %v287_v28 = vsel %vm643_vm6, %v284_v47, %v281_v46  ;;  %v290_v11 = vadd.f32 %v278_v24, %v608_v57 }
  0x4c   :  { %v319_v58 = vmul.f32 %v440_v51, %v585_v34  ;;  %v321_v59 = vsel %vm313_vm2, %v436_v39, %v317_v50  ;;  %v332_v60 = vsub.f32 1.0, %v320_v55  ;;  %v331_v34 = vadd.f32 1.0, %v327_v13 }
  0x4d   :  { %v322_v62 = vsel %vm314_vm4, %v438_v44, %v318_v54  ;;  %v333_v63 = vsub.f32 1.0, %v321_v59  ;;  %v291_v15 = vadd.f32 %v287_v28, %v612_v5 }
  0x4e   :  { %v323_v4 = vsel %vm315_vm7, %v440_v51, %v319_v58  ;;  %v334_v6 = vsub.f32 1.0, %v322_v62  ;;  %v336_v7 = vmul.f32 %v332_v60, %v332_v60 }
  0x4f   :  { %v335_v9 = vsub.f32 1.0, %v323_v4  ;;  %v337_v10 = vmul.f32 %v333_v63, %v333_v63 }
  0x50   :  { %v338_v12 = vmul.f32 %v334_v6, %v334_v6  ;;  %v340_v14 = vmul.f32 %v336_v7, %v328_v17 }
  0x51   :  { %v339_v16 = vmul.f32 %v335_v9, %v335_v9  ;;  %v341_v18 = vmul.f32 %v337_v10, %v329_v0 }
  0x52   :  { %v342_v19 = vmul.f32 %v338_v12, %v330_v35  ;;  %v344_v22 = vmul.f32 %v340_v14, %v288_v61 }
  0x53   :  { %v343_v56 = vmul.f32 %v339_v16, %v331_v34  ;;  %v345_v13 = vmul.f32 %v341_v18, %v289_v8 }
  0x54   :  { %v346_v57 = vmul.f32 %v342_v19, %v290_v11  ;;  %v372_v17 = vsel %vm368_vm8, %v344_v22, 0.0 }
  0x55   :  { %v347_v25 = vmul.f32 %v343_v56, %v291_v15  ;;  %v373_v20 = vsel %vm369_vm9, %v345_v13, 0.0 }
  0x56   :  { %v374_v21 = vsel %vm370_vm10, %v346_v57, 0.0  ;;  %v376_v32 = vadd.f32 %v373_v20, %v372_v17 }
  0x57   :  { %v375_v5 = vsel %vm371_vm11, %v347_v25, 0.0 }
  0x58   :  { %v377_v26 = vadd.f32 %v376_v32, %v374_v21 }
  0x5a   :  { %v378_v33 = vadd.f32 %v377_v26, %v375_v5 }
  0x5c   :  { %382 = vst [vmem:[#allocation7] sm:$0xff] %v378_v33 }
  0x5d   :  { %496 = shalt.err (!%p493_p6)
}
  0x5e   :  { %s497_s10 = scalar_lea.hbm %s682_s2, 128 }
  0x5f   :  { %p498_p7 = scmp.ne.s32.totalorder %s682_s2, %s497_s10  ;;  %p501_p8 = scmp.lt.u32.totalorder %s497_s10, %s682_s2 }
  0x61   :  { %p503_p9 = pnand %p501_p8, %p498_p7 }
  0x63   :  { %506 = shalt.err (!%p503_p9)
}
  0x64   :  { %392 = dma.vmem_to_hbm [thread:$0]  %s390_s6, 128, %s682_s2, [#allocation4]  }
  0x65   :  { %511 = dma.done.wait [#allocation4], 128  }
  0x66   :  { %512 = vsyncadd [#allocation4], 4294967168 }
  0x67   :  { %396 = vsyncpa [#allocation3], 1 }
  0x68   :  { %397 = vsyncpa [#allocation6], 1 }
  0x69   :  { %398 = vsyncpa [#allocation4], 1 }

</bundles_post_ra>
